<compile_context>
chip_gen: v5e
topology: v5e:2x2
jax: 0.10.0
libtpu: 0.0.40
codegen_flags: <defaults>
</compile_context>

<pallas_src>
import math
import numpy as np
import jax
import jax.numpy as jnp
from jax.experimental import pallas as pl
from jax.experimental.pallas import tpu as pltpu


def _model_kernel(weff_ref, beff_ref, x_ref, w2_ref, b2_ref, mask_ref, out_ref):
    # weff_ref : (Cin,) SMEM f32  -- conv_1 weights folded with the channel sum
    # beff_ref : (1,)   SMEM f32  -- conv_1 biases folded with the channel sum
    # x_ref    : (Cin, N, L) VMEM f32 -- top-left-shifted (by 2), contiguously
    #            flattened (Hp*Wp) spatial, zero tail-padded to L lanes
    # w2_ref   : (Cpad, N) VMEM f32 -- conv_2 1x1 weights (Cout zero-padded to 8)
    # b2_ref   : (Cpad, 1) VMEM f32
    # mask_ref : (1, L)   VMEM f32 -- 1.0 on interior output positions, 0.0 on
    #            the row-0/col-0 border and the flat-tail lane padding
    # out_ref  : (Cpad, L) VMEM f32
    Cin = x_ref.shape[0]

    # conv_1 (1x1, pad=1) folded with the sum over its output channels:
    #   v2 = b_eff + sum_c w_eff[c] * x[c]
    # First channel folded into the accumulator init (saves one full pass).
    v2 = weff_ref[0] * x_ref[0] + beff_ref[0]
    for c in range(1, Cin):
        v2 = v2 + weff_ref[c] * x_ref[c]

    # leaky_relu(negative_slope=0) == relu
    v5 = jnp.maximum(v2, 0.0)

    # conv_2 (1x1, pad=1) over v5 treated as an unbatched (C=N, Hp, Wp) image,
    # expressed as one MXU matmul: (Cpad, N) @ (N, L) -> (Cpad, L).
    # TODO(synk): Precision.HIGH (bf16_3x) would likely also clear the 1e-5
    # tolerance and is marginally cheaper, but HIGHEST is kept as the
    # known-good lowering for this tiny (K=8) matmul.
    wv = jnp.dot(w2_ref[...], v5,
                 preferred_element_type=jnp.float32,
                 precision=jax.lax.Precision.HIGHEST)

    # Output positions in row 0 / col 0 only ever see conv_2's zero padding,
    # so they reduce to the bias: single vmul with the precomputed mask.
    out_ref[...] = wv * mask_ref[...] + b2_ref[...]


def model_forward(x, w1, b1, w2, b2):
    """x: (N, C_in, H, W) NCHW; N must equal conv_2's in_channels (8)."""
    N, Cin, H, W = x.shape
    Cmid, Cout = w1.shape[0], w2.shape[0]
    assert w1.shape == (Cmid, Cin) and b1.shape == (Cmid,)
    assert w2.shape == (Cout, N) and b2.shape == (Cout,)
    assert Cout <= 8, "Cpad=8 handling assumes Cout <= 8"
    Hp, Wp = H + 2, W + 2
    S = Hp * Wp                       # valid flattened spatial size
    L = ((S + 127) // 128) * 128      # lane-padded (multiple of 128)
    Cpad = 8                          # full sublane group -> unmasked stores

    # Glue: top-left shift of 2 = conv_1's (1,1) zero padding + the one
    # row/col of conv_2's padding that survives the [:Hp, :Wp] slice; then
    # Cin-major, contiguous (Hp*Wp) flatten, zero tail-pad to L lanes.
    x_pad = jnp.pad(x.astype(jnp.float32), ((0, 0), (0, 0), (2, 0), (2, 0)))
    x_t = jnp.transpose(x_pad, (1, 0, 2, 3)).reshape(Cin, N, S)
    x_t = jnp.pad(x_t, ((0, 0), (0, 0), (0, L - S)))

    # Algebraic fold of conv_1 + channel sum.
    w_eff = jnp.sum(w1, axis=0).astype(jnp.float32)       # (Cin,)
    b_eff = jnp.sum(b1).reshape(1).astype(jnp.float32)    # (1,)

    w2_p = jnp.zeros((Cpad, N), jnp.float32).at[:Cout].set(w2.astype(jnp.float32))
    b2_p = jnp.zeros((Cpad, 1), jnp.float32).at[:Cout, 0].set(b2.astype(jnp.float32))

    # Compile-time constant 0/1 mask: 0 on output row 0 / col 0 (conv_2's
    # padding border -> bias only) and on the flat-tail lane padding.
    rows = np.arange(S) // Wp
    cols = np.arange(S) % Wp
    mask_np = np.zeros((1, L), np.float32)
    mask_np[0, :S] = ((rows != 0) & (cols != 0)).astype(np.float32)
    mask = jnp.asarray(mask_np)

    out_flat = pl.pallas_call(
        _model_kernel,
        out_shape=jax.ShapeDtypeStruct((Cpad, L), jnp.float32),
        in_specs=[
            pl.BlockSpec(memory_space=pltpu.MemorySpace.SMEM),   # w_eff
            pl.BlockSpec(memory_space=pltpu.MemorySpace.SMEM),   # b_eff
            pl.BlockSpec(memory_space=pltpu.MemorySpace.VMEM),   # x
            pl.BlockSpec(memory_space=pltpu.MemorySpace.VMEM),   # w2
            pl.BlockSpec(memory_space=pltpu.MemorySpace.VMEM),   # b2
            pl.BlockSpec(memory_space=pltpu.MemorySpace.VMEM),   # mask
        ],
        out_specs=pl.BlockSpec(memory_space=pltpu.MemorySpace.VMEM),
        compiler_params=pltpu.CompilerParams(
            # Let XLA fuse the pad/transpose/reshape staging of x (and the
            # tiny weight/bias/mask prep) directly into the pallas_call
            # inputs instead of writing a staged intermediate to HBM.
            allow_input_fusion=[False, False, True, True, True, True],
        ),
    )(w_eff, b_eff, x_t, w2_p, b2_p, mask)

    # Drop channel / lane padding and un-flatten the spatial dims.
    return out_flat[:Cout, :S].reshape(Cout, Hp, Wp)


def reference(x, w1, b1, w2, b2):
    """Pure-JAX reference of the (repaired) PyTorch forward (true f32)."""
    hp = jax.lax.Precision.HIGHEST
    xp = jnp.pad(x, ((0, 0), (0, 0), (1, 1), (1, 1)))
    v1 = jnp.einsum('oc,nchw->nohw', w1, xp, precision=hp) + b1[None, :, None, None]
    v2 = v1.sum(axis=1)
    v5 = jnp.where(v2 > 0, v2, v2 * 0.0)
    v6, v7 = v5.shape[-2], v5.shape[-1]
    v5p = jnp.pad(v5, ((0, 0), (1, 1), (1, 1)))            # conv_2 padding=1
    v8 = jnp.einsum('oc,chw->ohw', w2, v5p, precision=hp) + b2[:, None, None]
    v9 = v8[:, :v6, :v7]                                   # squeeze() is a no-op here
    return v9


if __name__ == "__main__":
    key = jax.random.PRNGKey(0)
    k1, k2, k3, k4, k5 = jax.random.split(key, 5)

    # N must be 8: conv_2 consumes the channel-summed 3-D tensor as an
    # unbatched (C=8, H, W) image.
    N, Cin, H, W = 8, 4, 16, 16
    x = jax.random.normal(k1, (N, Cin, H, W), jnp.float32)

    # Deterministic parameter init (PyTorch-style uniform bounds).
    bound1 = 1.0 / math.sqrt(Cin * 1 * 1)
    w1 = jax.random.uniform(k2, (8, Cin), jnp.float32, -bound1, bound1)
    b1 = jax.random.uniform(k3, (8,), jnp.float32, -bound1, bound1)
    bound2 = 1.0 / math.sqrt(8 * 1 * 1)
    w2 = jax.random.uniform(k4, (4, 8), jnp.float32, -bound2, bound2)
    b2 = jax.random.uniform(k5, (4,), jnp.float32, -bound2, bound2)

    fwd = jax.jit(model_forward)        # fuse the pad/transpose/fold glue
    out = jax.block_until_ready(fwd(x, w1, b1, w2, b2))

    ref = reference(x, w1, b1, w2, b2)
    assert out.shape == (4, H + 2, W + 2), out.shape
    np.testing.assert_allclose(np.asarray(out), np.asarray(ref),
                               rtol=1e-5, atol=1e-5)
    print("KERNEL_OK")
</pallas_src>

<mosaic_0001>
module attributes {stable_mosaic.version = 11 : i64} {
  func.func @_model_kernel(%arg0: memref<4xf32, #tpu.memory_space<smem>>, %arg1: memref<1xf32, #tpu.memory_space<smem>>, %arg2: memref<4x8x384xf32, #tpu.memory_space<vmem>>, %arg3: memref<8x8xf32, #tpu.memory_space<vmem>>, %arg4: memref<8x1xf32, #tpu.memory_space<vmem>>, %arg5: memref<1x384xf32, #tpu.memory_space<vmem>>, %arg6: memref<8x384xf32, #tpu.memory_space<vmem>>) attributes {dimension_semantics = [], scalar_prefetch = 0 : i64, scratch_operands = 0 : i64, tpu.core_type = #tpu.core_type<tc>} {
    %c0 = arith.constant 0 : index
    %0 = memref.load %arg0[%c0] : memref<4xf32, #tpu.memory_space<smem>>
    %c0_0 = arith.constant 0 : index
    %c0_1 = arith.constant 0 : index
    %c0_2 = arith.constant 0 : index
    %1 = vector.load %arg2[%c0_0, %c0_1, %c0_2] : memref<4x8x384xf32, #tpu.memory_space<vmem>>, vector<1x8x384xf32>
    %2 = vector.shape_cast %1 : vector<1x8x384xf32> to vector<8x384xf32>
    %3 = vector.broadcast %0 : f32 to vector<8x384xf32>
    %4 = arith.mulf %3, %2 : vector<8x384xf32>
    %c0_3 = arith.constant 0 : index
    %5 = memref.load %arg1[%c0_3] : memref<1xf32, #tpu.memory_space<smem>>
    %6 = vector.broadcast %5 : f32 to vector<8x384xf32>
    %7 = arith.addf %4, %6 : vector<8x384xf32>
    %c1 = arith.constant 1 : index
    %8 = memref.load %arg0[%c1] : memref<4xf32, #tpu.memory_space<smem>>
    %c1_4 = arith.constant 1 : index
    %c0_5 = arith.constant 0 : index
    %c0_6 = arith.constant 0 : index
    %9 = vector.load %arg2[%c1_4, %c0_5, %c0_6] : memref<4x8x384xf32, #tpu.memory_space<vmem>>, vector<1x8x384xf32>
    %10 = vector.shape_cast %9 : vector<1x8x384xf32> to vector<8x384xf32>
    %11 = vector.broadcast %8 : f32 to vector<8x384xf32>
    %12 = arith.mulf %11, %10 : vector<8x384xf32>
    %13 = arith.addf %7, %12 : vector<8x384xf32>
    %c2 = arith.constant 2 : index
    %14 = memref.load %arg0[%c2] : memref<4xf32, #tpu.memory_space<smem>>
    %c2_7 = arith.constant 2 : index
    %c0_8 = arith.constant 0 : index
    %c0_9 = arith.constant 0 : index
    %15 = vector.load %arg2[%c2_7, %c0_8, %c0_9] : memref<4x8x384xf32, #tpu.memory_space<vmem>>, vector<1x8x384xf32>
    %16 = vector.shape_cast %15 : vector<1x8x384xf32> to vector<8x384xf32>
    %17 = vector.broadcast %14 : f32 to vector<8x384xf32>
    %18 = arith.mulf %17, %16 : vector<8x384xf32>
    %19 = arith.addf %13, %18 : vector<8x384xf32>
    %c3 = arith.constant 3 : index
    %20 = memref.load %arg0[%c3] : memref<4xf32, #tpu.memory_space<smem>>
    %c3_10 = arith.constant 3 : index
    %c0_11 = arith.constant 0 : index
    %c0_12 = arith.constant 0 : index
    %21 = vector.load %arg2[%c3_10, %c0_11, %c0_12] : memref<4x8x384xf32, #tpu.memory_space<vmem>>, vector<1x8x384xf32>
    %22 = vector.shape_cast %21 : vector<1x8x384xf32> to vector<8x384xf32>
    %23 = vector.broadcast %20 : f32 to vector<8x384xf32>
    %24 = arith.mulf %23, %22 : vector<8x384xf32>
    %25 = arith.addf %19, %24 : vector<8x384xf32>
    %cst = arith.constant 0.000000e+00 : f32
    %26 = vector.broadcast %cst : f32 to vector<8x384xf32>
    %27 = arith.maximumf %25, %26 : vector<8x384xf32>
    %c0_13 = arith.constant 0 : index
    %c0_14 = arith.constant 0 : index
    %28 = vector.load %arg3[%c0_13, %c0_14] : memref<8x8xf32, #tpu.memory_space<vmem>>, vector<8x8xf32>
    %cst_15 = arith.constant dense<0.000000e+00> : vector<8x384xf32>
    %29 = tpu.matmul %28, %27, %cst_15 {dimension_numbers = #tpu.dot_dimension_numbers<[1], [0], [0], [1], [0, 0, 1, 1], [], []>, precision = #tpu.contract_precision<fp32>} : vector<8x8xf32>, vector<8x384xf32>, vector<8x384xf32> -> vector<8x384xf32>
    %c0_16 = arith.constant 0 : index
    %c0_17 = arith.constant 0 : index
    %30 = vector.load %arg5[%c0_16, %c0_17] : memref<1x384xf32, #tpu.memory_space<vmem>>, vector<1x384xf32>
    %31 = vector.broadcast %30 : vector<1x384xf32> to vector<8x384xf32>
    %32 = arith.mulf %29, %31 : vector<8x384xf32>
    %c0_18 = arith.constant 0 : index
    %c0_19 = arith.constant 0 : index
    %33 = vector.load %arg4[%c0_18, %c0_19] : memref<8x1xf32, #tpu.memory_space<vmem>>, vector<8x1xf32>
    %34 = vector.broadcast %33 : vector<8x1xf32> to vector<8x384xf32>
    %35 = arith.addf %32, %34 : vector<8x384xf32>
    %c0_20 = arith.constant 0 : index
    %c0_21 = arith.constant 0 : index
    %36 = vector.load %arg6[%c0_20, %c0_21] : memref<8x384xf32, #tpu.memory_space<vmem>>, vector<8x384xf32>
    tpu.vector_store %arg6[%c0_20, %c0_21], %35 {strides = array<i32>} : memref<8x384xf32, #tpu.memory_space<vmem>>, vector<8x384xf32>,
    return
  }
}

</mosaic_0001>

<bundles_post_ra>
// kernel: model_forward.2
= control target key start
LH: loop header
LB: loop body
LE: loop exit
PB: predicated region body
PF: predicated region fallthrough
CT: control target
= control target key end

     0   :  { %s909_s0 = inlined_call_operand.vmem [shape: f32[4], index: 0, kind: input, shape index: {}]   ;;  %s910_s1 = inlined_call_operand.<no memory space> [shape: f32[1], index: 1, kind: input, shape index: {}]   ;;  %s911_s2 = inlined_call_operand.vmem [shape: f32[1,384], index: 2, kind: input, shape index: {}]   ;;  %s912_s3 = inlined_call_operand.vmem [shape: f32[4,8,324], index: 3, kind: input, shape index: {}]   ;;  %s913_s4 = inlined_call_operand.<no memory space> [shape: f32[], index: 4, kind: input, shape index: {}]   ;;  %s914_s5 = inlined_call_operand.vmem [shape: f32[4,8], index: 5, kind: input, shape index: {}]   ;;  %s915_s6 = inlined_call_operand.vmem [shape: f32[4,1], index: 6, kind: input, shape index: {}]   ;;  %s916_s7 = inlined_call_operand.vmem [shape: f32[8,384], index: 7, kind: output, shape index: {}]  }
   0x1   :  { %v798_v0 = vstv %s913_s4 }
   0x2   :  { %16 = vsyncpa [#allocation19], 0  ;;  %s22_s28 = sshll.u32 %s909_s0, 4  ;;  %s753_s29 = smov [#allocation18]   ;;  %s23_s28 = int_to_ptr.vmem [resolvable:$true] %s22_s28 }
   0x3   :  { %25 = dma.vmem_to_smem %s23_s28, 16, %s753_s29, [#allocation19]  }
   0x4   :  { %751 = dma.done.wait [#allocation19], 16  }
   0x5   :  { %752 = vsyncadd [#allocation19], 4294967280 }
   0x6   :  { %40 = sfence }
   0x7   :  { %s199_s30 = sld [smem:[#allocation18]]  ;;  %v63_v1 = vlaneseq  ;;  %v171_v3 = vld [vmem:[%s914_s5] sm:$0xf]  ;;  %vm252_vm2 = vcmask 64512   ;;  %v722_v6 = vld [vmem:[%s912_s3 + $0x8] sm:$0xff]  ;;  %v724_v8 = vld [vmem:[%s912_s3 + $0x18] sm:$0xff]  ;;  %v208_v13 = vstv %s910_s1 }
   0x8   :  { %s733_s8 = sld [smem:[#allocation18 + $0x1]]  ;;  %v41_v5 = vld [vmem:[%s912_s3] sm:$0xff]  ;;  %v727_v11 = vld [vmem:[%s912_s3 + $0x30] sm:$0xff]  ;;  %v730_v15 = vld [vmem:[%s912_s3 + $0x48] sm:$0xff]  ;;  %v754_v59 = vmov 0  }
   0x9   :  { %s734_s9 = sld [smem:[#allocation18 + $0x2]]  ;;  %v803_v2 = vand.u32 127, %v63_v1  ;;  %v808_v4 = vshrl.u32 %v63_v1, 7  ;;  %v725_v10 = vld [vmem:[%s912_s3 + $0x20] sm:$0xff]  ;;  %v728_v19 = vld [vmem:[%s912_s3 + $0x38] sm:$0xff]  ;;  %v731_v20 = vld [vmem:[%s912_s3 + $0x50] sm:$0xff]  ;;  %738 = vset.pattern.permute.xlu0 %v754_v59 }
   0xa   :  { %s735_s11 = sld [smem:[#allocation18 + $0x3]]  ;;  %v723_v26 = vld [vmem:[%s912_s3 + $0x10] sm:$0xff]  ;;  %v726_v27 = vld [vmem:[%s912_s3 + $0x28] sm:$0xff]  ;;  %v729_v32 = vld [vmem:[%s912_s3 + $0x40] sm:$0xff] }
   0xb   :  { %vm175_vm0 = vcmp.lt.s32.totalorder %v808_v4, 4  ;;  %vm180_vm1 = vcmp.lt.s32.totalorder %v803_v2, 8  ;;  %v65_v7 = vadd.s32 256, %v803_v2  ;;  %v732_v37 = vld [vmem:[%s912_s3 + $0x58] sm:$0xff]  ;;  %v185_v56 = vld [vmem:[%s915_s6] sm:$0xf] }
   0xc   :  { %v176_v9 = vsel %vm175_vm0, %v171_v3, %v798_v0  ;;  %vm194_vm4 = vcmp.lt.s32.totalorder %v803_v2, 1  ;;  %v190_v60 = vsel %vm175_vm0, %v185_v56, %v798_v0 }
   0xd   :  { %v203_v12 = vstv %s199_s30  ;;  %v181_v14 = vsel %vm180_vm1, %v176_v9, %v798_v0  ;;  %vm66_vm3 = vcmp.lt.s32.totalorder %v65_v7, 324  ;;  %v195_v63 = vsel %vm194_vm4, %v190_v60, %v798_v0 }
   0xe   :  { %v204_v16 = vmul.f32 %v203_v12, %v41_v5  ;;  %v217_v17 = vstv %s733_s8  ;;  %v254_v18 = vsel %vm252_vm2, %v181_v14, 0  ;;  %v205_v21 = vmul.f32 %v722_v6, %v203_v12  ;;  %708 = vperm.xlu0 %738, %v195_v63  }
   0xf   :  { %v218_v22 = vmul.f32 %v724_v8, %v217_v17  ;;  %v229_v23 = vstv %s734_s9  ;;  %v844_v24 = vand.u32 4294901760, %v254_v18  ;;  %v219_v25 = vmul.f32 %v725_v10, %v217_v17 }
  0x10   :  { %v209_v28 = vadd.f32 %v208_v13, %v204_v16  ;;  %v230_v29 = vmul.f32 %v727_v11, %v229_v23  ;;  %v241_v30 = vstv %s735_s11  ;;  %v210_v31 = vadd.f32 %v208_v13, %v205_v21 }
  0x11   :  { %v242_v33 = vmul.f32 %v730_v15, %v241_v30  ;;  %v856_v34 = vsub.f32 %v254_v18, %v844_v24  ;;  %v231_v35 = vmul.f32 %v728_v19, %v229_v23  ;;  %v243_v36 = vmul.f32 %v731_v20, %v241_v30 }
  0x12   :  { %v221_v38 = vadd.f32 %v218_v22, %v209_v28  ;;  %v222_v39 = vadd.f32 %v219_v25, %v210_v31  ;;  %v67_v40 = vsel %vm66_vm3, %v723_v26, %v798_v0  ;;  %v100_v41 = vsel %vm66_vm3, %v726_v27, %v798_v0  ;;  %v694_v25 = vld [vmem:[%s911_s2] sm:$0x7] }
  0x13   :  { %v866_v42 = vand.u32 4294901760, %v856_v34  ;;  %v133_v43 = vsel %vm66_vm3, %v729_v32, %v798_v0  ;;  %v206_v44 = vmul.f32 %v203_v12, %v67_v40  ;;  %v166_v47 = vsel %vm66_vm3, %v732_v37, %v798_v0 }
  0x14   :  { %v233_v45 = vadd.f32 %v230_v29, %v221_v38  ;;  %v234_v46 = vadd.f32 %v231_v35, %v222_v39  ;;  %v220_v48 = vmul.f32 %v217_v17, %v100_v41  ;;  %v232_v51 = vmul.f32 %v229_v23, %v133_v43 }
  0x15   :  { %v276_v49 = vsub.f32 %v856_v34, %v866_v42  ;;  %v211_v50 = vadd.f32 %v208_v13, %v206_v44  ;;  %v244_v55 = vmul.f32 %v241_v30, %v166_v47  ;;  %v696_v28 = vperm.slane %v694_v25, 0 }
  0x16   :  { %v245_v52 = vadd.f32 %v242_v33, %v233_v45  ;;  %v246_v53 = vadd.f32 %v243_v36, %v234_v46  ;;  %v697_v44 = vperm.slane %v694_v25, 1  ;;  %v698_v56 = vperm.slane %v694_v25, 2 }
  0x17   :  { %v223_v54 = vadd.f32 %v220_v48, %v211_v50  ;;  %v277_v61 = vand.u32 4294901760, %v276_v49 }
  0x18   :  { %v248_v57 = vmax.f32 %v245_v52, 0.0  ;;  %v249_v58 = vmax.f32 %v246_v53, 0.0 }
  0x19   :  { %v235_v62 = vadd.f32 %v232_v51, %v223_v54 }
  0x1a   :  { %v271_v1 = vand.u32 4294901760, %v248_v57  ;;  %v417_v3 = vand.u32 4294901760, %v249_v58 }
  0x1b   :  { %v247_v5 = vadd.f32 %v244_v55, %v235_v62 }
  0x1c   :  { %v298_v6 = vsub.f32 %v248_v57, %v271_v1  ;;  %272 = vmatpush.msra.mxu0 %v271_v1  ;;  %348 = vmatpush.msra.mxu3 %v271_v1  ;;  %v444_v2 = vsub.f32 %v249_v58, %v417_v3 }
  0x1d   :  { %278 = vmatmul.f32.vlgmr.msra.gmra.mxu0 %v277_v61  ;;  %352 = vmatmul.f32.vlgmr.msra.gmra.mxu3 %v866_v42  ;;  %v250_v7 = vmax.f32 %v247_v5, 0.0 }
  0x1e   :  { %325 = vmatpush.msra.mxu2 %v298_v6  ;;  %v299_v8 = vand.u32 4294901760, %v298_v6  ;;  %v445_v4 = vand.u32 4294901760, %v444_v2 }
  0x1f   :  { %328 = vmatmul.f32.vlgmr.msra.gmra.mxu2 %v856_v34  ;;  %v563_v9 = vand.u32 4294901760, %v250_v7 }
  0x20   :  { %418 = vmatpush.msrb.mxu2 %v417_v3  ;;  %v300_v0 = vsub.f32 %v298_v6, %v299_v8  ;;  %374 = vmatpush.msrb.mxu0 %v299_v8  ;;  %v446_v10 = vsub.f32 %v444_v2, %v445_v4 }
  0x21   :  { %v590_v11 = vsub.f32 %v250_v7, %v563_v9 }
  0x22   :  { %520 = vmatpush.msra.mxu2 %v445_v4  ;;  %471 = vmatpush.msra.mxu0 %v444_v2  ;;  %v301_v12 = vand.u32 4294901760, %v300_v0  ;;  %v447_v13 = vand.u32 4294901760, %v446_v10 }
  0x23   :  { %v591_v14 = vand.u32 4294901760, %v590_v11 }
  0x24   :  { %302 = vmatpush.msra.mxu1 %v301_v12  ;;  %448 = vmatpush.msrb.mxu3 %v447_v13 }
  0x25   :  { %304 = vmatmul.f32.vlgmr.msra.gmra.mxu1 %v844_v24  ;;  %376 = vmatmul.f32.vlgmr.msrb.gmra.mxu0 %v844_v24  ;;  %v592_v15 = vsub.f32 %v590_v11, %v591_v14 }
  0x26   :  { %396 = vmatpush.msrb.mxu1 %v271_v1  ;;  %450 = vmatmul.f32.vlgmr.msrb.gmra.mxu3 %v844_v24 }
  0x27   :  { %424 = vmatmul.f32.vlgmr.msrb.gmra.mxu2 %v277_v61  ;;  %542 = vmatpush.msra.mxu3 %v417_v3  ;;  %v593_v16 = vand.u32 4294901760, %v592_v15 }
  0x28   :  { %494 = vmatpush.msra.mxu1 %v417_v3  ;;  %617 = vmatpush.msrb.mxu2 %v590_v11 }
  0x29   :  { %564 = vmatpush.msrb.mxu0 %v563_v9  ;;  %640 = vmatpush.msrb.mxu3 %v563_v9 }
  0x2d   :  { %398 = vmatmul.f32.vlgmr.msrb.gmra.mxu1 %v844_v24  ;;  %474 = vmatmul.f32.vlgmr.msra.gmra.mxu0 %v856_v34 }
  0x2e   :  { %544 = vmatmul.f32.vlgmr.msra.gmra.mxu3 %v844_v24  ;;  %594 = vmatpush.msrb.mxu1 %v593_v16 }
  0x2f   :  { %522 = vmatmul.f32.vlgmr.msra.gmra.mxu2 %v844_v24  ;;  %666 = vmatpush.msra.mxu0 %v591_v14 }
  0x35   :  { %498 = vmatmul.f32.vlgmr.msra.gmra.mxu1 %v866_v42  ;;  %570 = vmatmul.f32.vlgmr.msrb.gmra.mxu0 %v277_v61 }
  0x36   :  { %644 = vmatmul.f32.vlgmr.msrb.gmra.mxu3 %v866_v42  ;;  %688 = vmatpush.msra.mxu1 %v563_v9 }
  0x37   :  { %620 = vmatmul.f32.vlgmr.msrb.gmra.mxu2 %v856_v34 }
  0x3d   :  { %596 = vmatmul.f32.vlgmr.msrb.gmra.mxu1 %v844_v24  ;;  %668 = vmatmul.f32.vlgmr.msra.gmra.mxu0 %v844_v24 }
  0x45   :  { %690 = vmatmul.f32.vlgmr.msra.gmra.mxu1 %v844_v24 }
  0x80   :  { %v709_v33 = vpop.permute.xlu0 %708 }
  0x9a   :  { %v279_v17 = vpop.f32.mrf.mxu0 }
  0xa0   :  { %v353_v18 = vpop.f32.mrf.mxu3 }
  0xa2   :  { %v305_v19 = vpop.f32.mrf.mxu1  ;;  %v329_v20 = vpop.f32.mrf.mxu2 }
  0xa3   :  { %v306_v21 = vadd.f32 %v305_v19, %v279_v17  ;;  %v377_v22 = vpop.f32.mrf.mxu0 }
  0xa5   :  { %v330_v23 = vadd.f32 %v329_v20, %v306_v21 }
  0xa7   :  { %v354_v26 = vadd.f32 %v353_v18, %v330_v23 }
  0xa9   :  { %v378_v27 = vadd.f32 %v377_v22, %v354_v26  ;;  %v451_v29 = vpop.f32.mrf.mxu3 }
  0xaa   :  { %v399_v30 = vpop.f32.mrf.mxu1  ;;  %v425_v31 = vpop.f32.mrf.mxu2 }
  0xab   :  { %v400_v32 = vadd.f32 %v399_v30, %v378_v27  ;;  %v475_v24 = vpop.f32.mrf.mxu0  ;;  %v452_v35 = vadd.f32 %v451_v29, %v425_v31 }
  0xad   :  { %v702_v34 = vmul.f32 %v696_v28, %v400_v32  ;;  %v476_v37 = vadd.f32 %v475_v24, %v452_v35 }
  0xaf   :  { %v711_v36 = vadd.f32 %v709_v33, %v702_v34 }
  0xb1   :  { %714 = vst [vmem:[%s916_s7] sm:$0xff] %v711_v36  ;;  %v545_v38 = vpop.f32.mrf.mxu3 }
  0xb2   :  { %v499_v39 = vpop.f32.mrf.mxu1  ;;  %v523_v40 = vpop.f32.mrf.mxu2 }
  0xb3   :  { %v500_v41 = vadd.f32 %v499_v39, %v476_v37  ;;  %v571_v42 = vpop.f32.mrf.mxu0 }
  0xb5   :  { %v524_v43 = vadd.f32 %v523_v40, %v500_v41 }
  0xb7   :  { %v546_v45 = vadd.f32 %v545_v38, %v524_v43 }
  0xb9   :  { %v703_v46 = vmul.f32 %v697_v44, %v546_v45  ;;  %v645_v51 = vpop.f32.mrf.mxu3 }
  0xba   :  { %v597_v47 = vpop.f32.mrf.mxu1  ;;  %v621_v48 = vpop.f32.mrf.mxu2 }
  0xbb   :  { %v712_v49 = vadd.f32 %v709_v33, %v703_v46  ;;  %v598_v50 = vadd.f32 %v597_v47, %v571_v42  ;;  %v669_v53 = vpop.f32.mrf.mxu0 }
  0xbd   :  { %715 = vst [vmem:[%s916_s7 + $0x8] sm:$0xff] %v712_v49  ;;  %v622_v52 = vadd.f32 %v621_v48, %v598_v50 }
  0xbf   :  { %v646_v54 = vadd.f32 %v645_v51, %v622_v52 }
  0xc1   :  { %v670_v55 = vadd.f32 %v669_v53, %v646_v54 }
  0xc2   :  { %v691_v57 = vpop.f32.mrf.mxu1 }
  0xc3   :  { %v692_v58 = vadd.f32 %v691_v57, %v670_v55 }
  0xc5   :  { %v704_v59 = vmul.f32 %v698_v56, %v692_v58 }
  0xc7   :  { %v713_v60 = vadd.f32 %v709_v33, %v704_v59 }
  0xc9   :  { %716 = vst [vmem:[%s916_s7 + $0x10] sm:$0xff] %v713_v60 }
  0xca   :  { %721 = vsyncpa [#allocation19], 1 }

</bundles_post_ra>
